<compile_context>
chip_gen: v5e
topology: v5e:2x2
jax: 0.10.0
libtpu: 0.0.40
codegen_flags: <defaults>
</compile_context>

<pallas_src>
import functools

import jax
import jax.numpy as jnp
from jax.experimental import pallas as pl
from jax.experimental.pallas import tpu as pltpu

_LANE = 128


def _round_up(x, m):
    return ((x + m - 1) // m) * m


# ---- generation-aware VMEM budget (queried once, outside the jitted path) ----
try:  # 128 MiB on v5e/v6e, 64 MiB per-TC on v7x
    _VMEM_CAP = int(pltpu.get_tpu_info().vmem_capacity_bytes)
except Exception:  # conservative (v7x-sized) fallback
    _VMEM_CAP = 64 << 20
# Leave headroom for Mosaic internal scratch; cap at ~100 MiB on 128 MiB parts.
_USABLE_VMEM = min((_VMEM_CAP * 3) // 4, 100 << 20)


def prepare_block_params(weight, bias, compute_dtype=jnp.bfloat16):
    """One-time parameter prep (call at load time, NOT per forward call):
    pad the hidden dim to a 128-lane multiple, transpose the PyTorch (out, in)
    weight to (in, out) so the kernel runs a standard MXU-native contraction,
    and cast the weight to the compute dtype.  Bias stays f32."""
    H = weight.shape[1]
    Hp = _round_up(H, _LANE)
    if Hp != H:
        weight = jnp.pad(weight, ((0, Hp - H), (0, Hp - H)))
        bias = jnp.pad(bias, (0, Hp - H))
    w_t = jnp.asarray(weight.T, dtype=compute_dtype)      # (in, out) = (Hp, Hp)
    b2 = jnp.asarray(bias, jnp.float32).reshape(1, Hp)
    return w_t, b2


def block_kernel(x_ref, w_ref, b_ref, a_ref, o_ref):
    # Linear: standard (M,K)x(K,N) MXU contraction with f32 accumulation.
    y = jnp.dot(x_ref[...], w_ref[...], preferred_element_type=jnp.float32)
    y = y + b_ref[...]                       # bias [1, tn] broadcasts over rows
    a = a_ref[0]                             # single PReLU slope, SMEM scalar
    # PReLU: max(0, y) + a * min(0, y)
    o_ref[...] = jnp.where(y > 0.0, y, a * y).astype(o_ref.dtype)


def _pick_tiles(B, Hp, x_itemsize, w_itemsize):
    """Pick the batch tile (sublane-packed for the compute dtype) and the
    output-column tile so the resident weight block fits the generation's
    usable VMEM alongside double-buffered x / out tiles."""
    sublane = 16 if x_itemsize == 2 else 8
    tm_cap = 512 if _USABLE_VMEM >= (80 << 20) else 256     # smaller tm on v7x
    tm = min(tm_cap, _round_up(B, sublane))
    # v6e/v7x MXUs are 2x256 wide: keep tn a 256-multiple whenever H allows.
    align = 256 if Hp % 256 == 0 else _LANE

    def fits(tn_):
        w_bytes = tn_ * Hp * w_itemsize          # single-buffered resident weight
        x_bytes = 2 * tm * Hp * x_itemsize       # double-buffered x tile
        o_bytes = 2 * tm * tn_ * 4               # double-buffered f32 out tile
        misc = 2 * tn_ * 4 + (2 << 20)
        return w_bytes + x_bytes + o_bytes + misc <= _USABLE_VMEM

    tn = Hp
    while not fits(tn) and tn % (2 * align) == 0:
        tn //= 2
    return tm, tn, sublane


@jax.jit
def block_forward(x, w_t, b2, prelu_a):
    """x: [B, H]; w_t: [Hp, Hp] pre-padded/transposed/cast weight from
    prepare_block_params; b2: [1, Hp] f32 bias; prelu_a: scalar slope."""
    B, H = x.shape
    Hp = w_t.shape[0]
    compute_dtype = w_t.dtype
    xsize = jnp.dtype(compute_dtype).itemsize
    wsize = xsize

    # ---- x: cast to compute dtype, pad the hidden dim to lane alignment -----
    xp = x.astype(compute_dtype)
    if Hp != H:
        xp = jnp.pad(xp, ((0, 0), (0, Hp - H)))

    tm, tn, sublane = _pick_tiles(B, Hp, xsize, wsize)
    Bp = _round_up(B, tm)
    num_m = Bp // tm
    num_n = Hp // tn

    # v7x has 2 TensorCores: ensure at least one parallel axis has >= 2 blocks.
    if num_m == 1 and num_n == 1 and _round_up(B, sublane) >= 2 * sublane:
        tm = _round_up((B + 1) // 2, sublane)
        Bp = _round_up(B, tm)
        num_m = Bp // tm

    if Bp != B:
        xp = jnp.pad(xp, ((0, Bp - B), (0, 0)))

    a1 = jnp.asarray(prelu_a, jnp.float32).reshape((1,))

    # ---- grid order: minimize re-streamed HBM bytes ---------------------------
    # n-outer => x re-read num_n times; m-outer => weight re-read num_m times.
    n_outer = num_n * Bp * Hp <= num_m * Hp * Hp

    if n_outer:
        grid = (num_n, num_m)
        # Weight block index is constant across the inner (m) loop -> resident,
        # single-buffered; x/out stay double-buffered (pipelined).
        x_spec = pl.BlockSpec((tm, Hp), lambda j, i: (i, 0))
        w_spec = pl.BlockSpec((Hp, tn), lambda j, i: (0, j),
                              pipeline_mode=pl.Buffered(1))
        b_spec = pl.BlockSpec((1, tn), lambda j, i: (0, j))
        o_spec = pl.BlockSpec((tm, tn), lambda j, i: (i, j))
        w_bufs, x_bufs = 1, 2
        x_reads, w_reads = num_n, 1
    else:
        grid = (num_m, num_n)
        # x block index is constant across the inner (n) loop -> resident,
        # single-buffered; weight tiles stream (double-buffered).
        x_spec = pl.BlockSpec((tm, Hp), lambda i, j: (i, 0),
                              pipeline_mode=pl.Buffered(1))
        w_spec = pl.BlockSpec((Hp, tn), lambda i, j: (0, j))
        b_spec = pl.BlockSpec((1, tn), lambda i, j: (0, j))
        o_spec = pl.BlockSpec((tm, tn), lambda i, j: (i, j))
        w_bufs, x_bufs = 2, 1
        x_reads, w_reads = 1, num_m

    needed = (w_bufs * Hp * tn * wsize + x_bufs * tm * Hp * xsize
              + 2 * tm * tn * 4 + 2 * 2 * tn * 4)
    vmem_limit = int(min(max(needed + (8 << 20), 32 << 20), _USABLE_VMEM))

    out = pl.pallas_call(
        block_kernel,
        out_shape=jax.ShapeDtypeStruct((Bp, Hp), jnp.float32),
        grid_spec=pltpu.PrefetchScalarGridSpec(
            num_scalar_prefetch=0,
            grid=grid,
            in_specs=[
                x_spec,                                          # x tile
                w_spec,                                          # W (in, out)
                b_spec,                                          # bias
                pl.BlockSpec(memory_space=pltpu.MemorySpace.SMEM),  # PReLU slope
            ],
            out_specs=o_spec,
        ),
        compiler_params=pltpu.CompilerParams(
            dimension_semantics=("parallel", "parallel"),
            vmem_limit_bytes=vmem_limit,
        ),
        cost_estimate=pl.CostEstimate(
            flops=2 * Bp * Hp * Hp,
            transcendentals=0,
            bytes_accessed=int(x_reads * Bp * Hp * xsize
                               + w_reads * Hp * Hp * wsize
                               + 4 * Bp * Hp + 4 * Hp),
        ),
    )(xp, w_t, b2, a1)

    return out[:B, :H]


if __name__ == "__main__":
    # Small shapes consistent with the module: num_hidden = 32, batch = 8.
    B, H = 8, 32

    key = jax.random.PRNGKey(0)
    kx, kw, kb = jax.random.split(key, 3)

    bound = 1.0 / (H ** 0.5)
    x = jax.random.normal(kx, (B, H), dtype=jnp.float32)
    weight = jax.random.uniform(kw, (H, H), minval=-bound, maxval=bound,
                                dtype=jnp.float32)   # PyTorch (out, in) layout
    bias = jax.random.uniform(kb, (H,), minval=-bound, maxval=bound,
                              dtype=jnp.float32)
    prelu_a = jnp.float32(0.25)                      # nn.PReLU() default init

    # One-time parameter prep (pad / transpose / cast) outside the hot path.
    w_t, b2 = prepare_block_params(weight, bias, compute_dtype=jnp.bfloat16)

    out = block_forward(x, w_t, b2, prelu_a)
    out = jax.block_until_ready(out)

    # Reference with the same bf16 operand cast + f32 accumulation.
    ref_lin = jax.lax.dot_general(
        x.astype(jnp.bfloat16), weight.astype(jnp.bfloat16),
        dimension_numbers=(((1,), (1,)), ((), ())),
        preferred_element_type=jnp.float32) + bias
    ref = jnp.where(ref_lin > 0, ref_lin, prelu_a * ref_lin)

    # Loose check against the full-f32 module semantics as well.
    ref_lin_f32 = x @ weight.T + bias
    ref_f32 = jnp.where(ref_lin_f32 > 0, ref_lin_f32, prelu_a * ref_lin_f32)

    assert out.shape == (B, H)
    assert jnp.allclose(out, ref, atol=1e-4, rtol=1e-4), "mismatch vs bf16 reference"
    assert jnp.allclose(out, ref_f32, atol=2e-2, rtol=2e-2), "mismatch vs f32 reference"

    print("KERNEL_OK")
</pallas_src>

<mosaic_0001>
module attributes {stable_mosaic.version = 11 : i64} {
  func.func @block_kernel(%arg0: i32, %arg1: i32, %arg2: memref<16x128xbf16, #tpu.memory_space<vmem>>, %arg3: memref<128x128xbf16, #tpu.memory_space<vmem>>, %arg4: memref<1x128xf32, #tpu.memory_space<vmem>>, %arg5: memref<1xf32, #tpu.memory_space<smem>>, %arg6: memref<16x128xf32, #tpu.memory_space<vmem>>) attributes {dimension_semantics = [#tpu.dimension_semantics<parallel>, #tpu.dimension_semantics<parallel>], iteration_bounds = array<i64: 1, 1>, scalar_prefetch = 0 : i64, scratch_operands = 0 : i64, tpu.core_type = #tpu.core_type<tc>, window_params = [{transform_indices = @transform_0, window_bounds = array<i64: 16, 128>}, {pipeline_mode = #tpu.pipeline_mode<synchronous>, transform_indices = @transform_1, window_bounds = array<i64: 128, 128>}, {transform_indices = @transform_2, window_bounds = array<i64: 1, 128>}, {transform_indices = @transform_3, window_bounds = array<i64: 1>}, {transform_indices = @transform_4, window_bounds = array<i64: 16, 128>}]} {
    %c0 = arith.constant 0 : index
    %c0_0 = arith.constant 0 : index
    %0 = vector.load %arg2[%c0, %c0_0] : memref<16x128xbf16, #tpu.memory_space<vmem>>, vector<16x128xbf16>
    %c0_1 = arith.constant 0 : index
    %c0_2 = arith.constant 0 : index
    %1 = vector.load %arg3[%c0_1, %c0_2] : memref<128x128xbf16, #tpu.memory_space<vmem>>, vector<128x128xbf16>
    %cst = arith.constant dense<0.000000e+00> : vector<16x128xf32>
    %2 = tpu.matmul %0, %1, %cst {dimension_numbers = #tpu.dot_dimension_numbers<[1], [0], [0], [1], [0, 0, 1, 1], [], []>} : vector<16x128xbf16>, vector<128x128xbf16>, vector<16x128xf32> -> vector<16x128xf32>
    %c0_3 = arith.constant 0 : index
    %c0_4 = arith.constant 0 : index
    %3 = vector.load %arg4[%c0_3, %c0_4] : memref<1x128xf32, #tpu.memory_space<vmem>>, vector<1x128xf32>
    %4 = vector.broadcast %3 : vector<1x128xf32> to vector<16x128xf32>
    %5 = arith.addf %2, %4 : vector<16x128xf32>
    %c0_5 = arith.constant 0 : index
    %6 = memref.load %arg5[%c0_5] : memref<1xf32, #tpu.memory_space<smem>>
    %cst_6 = arith.constant 0.000000e+00 : f32
    %7 = vector.broadcast %cst_6 : f32 to vector<16x128xf32>
    %8 = arith.cmpf ogt, %5, %7 : vector<16x128xf32>
    %9 = vector.broadcast %6 : f32 to vector<16x128xf32>
    %10 = arith.mulf %9, %5 : vector<16x128xf32>
    %11 = arith.select %8, %5, %10 : vector<16x128xi1>, vector<16x128xf32>
    %c0_7 = arith.constant 0 : index
    %c0_8 = arith.constant 0 : index
    %12 = vector.load %arg6[%c0_7, %c0_8] : memref<16x128xf32, #tpu.memory_space<vmem>>, vector<16x128xf32>
    tpu.vector_store %arg6[%c0_7, %c0_8], %11 {strides = array<i32>} : memref<16x128xf32, #tpu.memory_space<vmem>>, vector<16x128xf32>,
    return
  }
  func.func @transform_0(%arg0: i32, %arg1: i32) -> (i32, i32) {
    %c0_i32 = arith.constant 0 : i32
    %c0_i32_0 = arith.constant 0 : i32
    return %arg1, %c0_i32 : i32, i32
  }
  func.func @transform_1(%arg0: i32, %arg1: i32) -> (i32, i32) {
    %c0_i32 = arith.constant 0 : i32
    %c0_i32_0 = arith.constant 0 : i32
    return %c0_i32, %arg0 : i32, i32
  }
  func.func @transform_2(%arg0: i32, %arg1: i32) -> (i32, i32) {
    %c0_i32 = arith.constant 0 : i32
    %c0_i32_0 = arith.constant 0 : i32
    return %c0_i32, %arg0 : i32, i32
  }
  func.func @transform_3(%arg0: i32, %arg1: i32) -> i32 {
    %c0_i32 = arith.constant 0 : i32
    %c0_i32_0 = arith.constant 0 : i32
    return %c0_i32 : i32
  }
  func.func @transform_4(%arg0: i32, %arg1: i32) -> (i32, i32) {
    %c0_i32 = arith.constant 0 : i32
    return %arg1, %arg0 : i32, i32
  }
}

</mosaic_0001>

<bundles_post_ra>
// kernel: block_forward.1
= control target key start
LH: loop header
LB: loop body
LE: loop exit
PB: predicated region body
PF: predicated region fallthrough
CT: control target
= control target key end

     0   :  { %10 = vsyncpa [#allocation4], 0  ;;  %s214_s18 = smov [#allocation3]   ;;  %s215_s20 = smov 64   ;;  %s260_s0 = inlined_call_operand.vmem [shape: bf16[16,128], index: 0, kind: input, shape index: {}]   ;;  %s261_s1 = inlined_call_operand.hbm [shape: bf16[128,128], index: 1, kind: input, shape index: {}]   ;;  %s262_s2 = inlined_call_operand.vmem [shape: f32[1,128], index: 2, kind: input, shape index: {}]   ;;  %s263_s3 = inlined_call_operand.<no memory space> [shape: f32[1], index: 3, kind: input, shape index: {}]   ;;  %s264_s4 = inlined_call_operand.vmem [shape: f32[16,128], index: 4, kind: output, shape index: {}]  }
   0x1   :  { %s17_s17 = sshll.u32 %s261_s1, 4  ;;  %s19_s19 = sshll.u32 %s214_s18, 4  ;;  %s18_s17 = int_to_ptr.hbm [resolvable:$true] %s17_s17  ;;  %s20_s19 = int_to_ptr.vmem [resolvable:$true] %s19_s19 }
   0x2   :  { %s216_s21 = smov 4  }
   0x3   :  { %25 = dma.hbm_to_vmem [thread:$0]  %s18_s17, 1024, %s20_s19, [#allocation4], %s215_s20, %s215_s20, %s216_s21  }
   0x4   :  { %212 = dma.done.wait [#allocation4], 1024  }
   0x5   :  { %213 = vsyncadd [#allocation4], 4294966272  ;;  %v183_v0 = vld [vmem:[#allocation3 + $0x38] sm:$0xff]  ;;  %v182_v1 = vld [vmem:[#allocation3 + $0x30] sm:$0xff]  ;;  %v127_v11 = vstv %s263_s3 }
   0x6   :  { %110 = vmatpush.bf16.msra.mxu0 %v183_v0  ;;  %v181_v2 = vld [vmem:[#allocation3 + $0x28] sm:$0xff]  ;;  %v180_v3 = vld [vmem:[#allocation3 + $0x20] sm:$0xff]  ;;  %v179_v4 = vld [vmem:[#allocation3 + $0x18] sm:$0xff] }
   0x7   :  { %v178_v5 = vld [vmem:[#allocation3 + $0x10] sm:$0xff]  ;;  %v177_v6 = vld [vmem:[#allocation3 + $0x8] sm:$0xff]  ;;  %v176_v7 = vld [vmem:[#allocation3] sm:$0xff] }
   0x8   :  { %v175_v8 = vld [vmem:[%s260_s0] sm:$0xff] }
   0x9   :  { %v187_v9 = vld [vmem:[%s262_s2] ss:$0 sm:$0xff] }
   0xa   :  { %111 = vmatpush.bf16.msra.mxu0 %v182_v1 }
   0xe   :  { %112 = vmatpush.bf16.msra.mxu0 %v181_v2 }
  0x12   :  { %113 = vmatpush.bf16.msra.mxu0 %v180_v3 }
  0x16   :  { %114 = vmatpush.bf16.msra.mxu0 %v179_v4 }
  0x1a   :  { %115 = vmatpush.bf16.msra.mxu0 %v178_v5 }
  0x1e   :  { %116 = vmatpush.bf16.msra.mxu0 %v177_v6 }
  0x22   :  { %117 = vmatpush.bf16.msra.mxu0 %v176_v7 }
  0x25   :  { %118 = vmatmul.bf16.vlgmr.msra.gmra.mxu0 %v175_v8 }
  0xa2   :  { %v119_v10 = vpop.f32.mrf.mxu0 }
  0xa3   :  { %v120_v12 = vadd.f32 %v187_v9, %v119_v10 }
  0xa5   :  { %vm125_vm0 = vcmp.gt.f32.partialorder %v120_v12, 0.0  ;;  %v128_v13 = vmul.f32 %v127_v11, %v120_v12 }
  0xa7   :  { %v130_v14 = vsel %vm125_vm0, %v120_v12, %v128_v13 }
  0xa8   :  { %132 = vst [vmem:[%s264_s4] sm:$0xff] %v130_v14 }
  0xaa   :  { %v121_v15 = vpop.f32.mrf.mxu0 }
  0xab   :  { %v122_v16 = vadd.f32 %v187_v9, %v121_v15 }
  0xad   :  { %vm126_vm1 = vcmp.gt.f32.partialorder %v122_v16, 0.0  ;;  %v129_v17 = vmul.f32 %v127_v11, %v122_v16 }
  0xaf   :  { %v131_v18 = vsel %vm126_vm1, %v122_v16, %v129_v17 }
  0xb0   :  { %133 = vst [vmem:[%s264_s4 + $0x8] sm:$0xff] %v131_v18 }
  0xb1   :  { %138 = vsyncpa [#allocation4], 1 }

</bundles_post_ra>
